<compile_context>
chip_gen: v7x
topology: tpu7x:2x2x1
jax: 0.10.0
libtpu: 0.0.40
codegen_flags: <defaults>
</compile_context>

<pallas_src>
import functools
from typing import NamedTuple

import jax
import jax.numpy as jnp
from jax import lax
from jax.experimental import pallas as pl
from jax.experimental.pallas import tpu as pltpu


def _relu6(x):
    return jnp.minimum(jnp.maximum(x, 0.0), 6.0)


def _round_up(n, m):
    return ((n + m - 1) // m) * m


class QNetworkSpec(NamedTuple):
    n_in: int
    n_in_pad: int
    n_out: int
    n_out_pad: int


# ----------------------------------------------------------------------------
# Kernel
# ----------------------------------------------------------------------------
def _make_kernel(n_out, emit_q):
    """Kernel for one batch tile.  Outputs: ([q_tile_bf16,] act_tile_int32)."""

    def kernel(x_ref,
               w1, b1, w2, b2, w3, b3, w4, b4, w5, b5, w6, b6,
               *out_refs):
        def layer(h, w_ref, b_ref, activate):
            # bf16 operands on the MXU, f32 accumulation; bias-add / relu6 on
            # the VPU in f32.
            y = jnp.dot(h.astype(w_ref.dtype), w_ref[...],
                        preferred_element_type=jnp.float32) + b_ref[...]
            return _relu6(y) if activate else y

        h = x_ref[...]
        for w_ref, b_ref in ((w1, b1), (w2, b2), (w3, b3), (w4, b4), (w5, b5)):
            h = layer(h, w_ref, b_ref, True)
        q = layer(h, w6, b6, False)          # (bt, n_out_pad) f32

        if emit_q:
            out_refs[0][...] = q.astype(out_refs[0].dtype)

        # Fused argmax over the real (unpadded) columns; padded columns are
        # masked to -inf so they can never win.  Ties -> lowest index.
        act_ref = out_refs[-1]
        col = lax.broadcasted_iota(jnp.int32, q.shape, dimension=1)
        qm = jnp.where(col < n_out, q, jnp.float32(-3.0e38))
        mx = jnp.max(qm, axis=-1, keepdims=True)
        first = jnp.min(jnp.where(qm >= mx, col, jnp.int32(q.shape[-1])),
                        axis=-1, keepdims=True)
        act_ref[...] = first.astype(jnp.int32)

    return kernel


# ----------------------------------------------------------------------------
# One-time parameter preparation (do NOT call per step)
# ----------------------------------------------------------------------------
def prepare_params(params, weight_dtype=jnp.bfloat16):
    """params: list of 6 (W, b) with W (in, out), b (out,) or (1, out).

    Returns (spec, flat) where flat is a tuple of 12 device arrays:
    W1 rows padded to a multiple of 128 (lane-dense layer-1 LHS), final-layer
    W/b columns padded to a multiple of 128 (lane-dense output store), weights
    cast to bf16, biases kept f32.
    """
    n_in = params[0][0].shape[0]
    n_out = params[-1][0].shape[1]
    n_in_pad = _round_up(n_in, 128)
    n_out_pad = _round_up(n_out, 128)

    flat = []
    last = len(params) - 1
    for li, (w, b) in enumerate(params):
        w = jnp.asarray(w)
        b = jnp.asarray(b).reshape(1, -1)
        if li == 0 and n_in_pad != n_in:
            w = jnp.pad(w, ((0, n_in_pad - n_in), (0, 0)))
        if li == last and n_out_pad != n_out:
            w = jnp.pad(w, ((0, 0), (0, n_out_pad - n_out)))
            b = jnp.pad(b, ((0, 0), (0, n_out_pad - n_out)))
        flat.append(w.astype(weight_dtype))
        flat.append(b.astype(jnp.float32))

    spec = QNetworkSpec(n_in=n_in, n_in_pad=n_in_pad,
                        n_out=n_out, n_out_pad=n_out_pad)
    return spec, tuple(flat)


# ----------------------------------------------------------------------------
# pallas_call builder
# ----------------------------------------------------------------------------
_MIN_SPLIT = 256  # above this batch size, force >=2 grid steps (v7x has 2 TCs)


def _choose_tile(B, batch_tile):
    b8 = _round_up(max(B, 1), 8)
    bt = min(_round_up(batch_tile, 8), b8)
    # If the batch is large but would fit in fewer than 2 tiles, split it so
    # the "parallel" batch axis can shard across both v7x TensorCores.
    if b8 > _MIN_SPLIT and b8 < 2 * bt:
        bt = _round_up((b8 + 1) // 2, 8)
    B_pad = _round_up(b8, bt)
    return bt, B_pad


def _qnetwork_pallas(x_p, flat, spec, bt, emit_q, q_dtype):
    B_pad = x_p.shape[0]
    grid = (B_pad // bt,)

    # Batch is tiled over the grid; weights/biases use a constant index_map so
    # Pallas keeps them resident in VMEM across grid steps (no re-DMA).
    in_specs = [pl.BlockSpec((bt, spec.n_in_pad), lambda i: (i, 0))]
    for a in flat:
        in_specs.append(pl.BlockSpec(a.shape, lambda i: (0, 0)))

    out_shapes, out_specs = [], []
    if emit_q:
        out_shapes.append(jax.ShapeDtypeStruct((B_pad, spec.n_out_pad), q_dtype))
        out_specs.append(pl.BlockSpec((bt, spec.n_out_pad), lambda i: (i, 0)))
    out_shapes.append(jax.ShapeDtypeStruct((B_pad, 1), jnp.int32))
    out_specs.append(pl.BlockSpec((bt, 1), lambda i: (i, 0)))

    dims = [flat[0].shape[0]] + [flat[2 * i].shape[1] for i in range(6)]
    flops = 2 * B_pad * sum(dims[i] * dims[i + 1] for i in range(6))
    weight_bytes = sum(int(a.size) * a.dtype.itemsize for a in flat)
    out_bytes = B_pad * 4
    if emit_q:
        out_bytes += B_pad * spec.n_out_pad * jnp.dtype(q_dtype).itemsize
    bytes_accessed = int(x_p.size) * x_p.dtype.itemsize + weight_bytes + out_bytes

    return pl.pallas_call(
        _make_kernel(spec.n_out, emit_q),
        out_shape=tuple(out_shapes),
        grid_spec=pltpu.PrefetchScalarGridSpec(
            num_scalar_prefetch=0,
            grid=grid,
            in_specs=in_specs,
            out_specs=tuple(out_specs),
        ),
        compiler_params=pltpu.CompilerParams(
            dimension_semantics=("parallel",),
        ),
        cost_estimate=pl.CostEstimate(
            flops=flops, transcendentals=0, bytes_accessed=bytes_accessed),
    )(x_p, *flat)


# ----------------------------------------------------------------------------
# Jitted wrappers (pad / slice fuse with the pallas_call)
# ----------------------------------------------------------------------------
@functools.partial(jax.jit, static_argnames=("spec", "batch_tile", "q_dtype"))
def qnetwork_forward(x, flat, *, spec, batch_tile=512, q_dtype=jnp.bfloat16):
    """x: (B, n_in).  Returns Q-values (B, n_out) in `q_dtype` (default bf16)."""
    B, n_in = x.shape
    assert n_in == spec.n_in
    bt, B_pad = _choose_tile(B, batch_tile)
    x_p = jnp.pad(x, ((0, B_pad - B), (0, spec.n_in_pad - n_in)))
    q, _ = _qnetwork_pallas(x_p, flat, spec, bt, True, q_dtype)
    return q[:B, :spec.n_out]


@functools.partial(jax.jit, static_argnames=("spec", "batch_tile"))
def qnetwork_select_action(x, flat, *, spec, batch_tile=512):
    """x: (B, n_in).  Returns int32 greedy actions (B,) — argmax fused in-kernel,
    no Q-value HBM writeback."""
    B, n_in = x.shape
    assert n_in == spec.n_in
    bt, B_pad = _choose_tile(B, batch_tile)
    x_p = jnp.pad(x, ((0, B_pad - B), (0, spec.n_in_pad - n_in)))
    (act,) = _qnetwork_pallas(x_p, flat, spec, bt, False, jnp.bfloat16)
    return act[:B, 0]


# ----------------------------------------------------------------------------
# Reference init / forward (mirrors the PyTorch module)
# ----------------------------------------------------------------------------
def init_params(key, inputs, outputs):
    dims = [inputs, 128, 256, 512, 256, 128, outputs]
    params = []
    for li in range(len(dims) - 1):
        fan_in, fan_out = dims[li], dims[li + 1]
        key, wk, bk = jax.random.split(key, 3)
        bound = 1.0 / jnp.sqrt(fan_in)
        w = jax.random.uniform(wk, (fan_in, fan_out), jnp.float32, -bound, bound)
        b = jax.random.uniform(bk, (1, fan_out), jnp.float32, -bound, bound)
        params.append((w, b))
    return params


def reference_forward_f32(x, params):
    h = x
    for i, (w, b) in enumerate(params):
        h = h @ w + b
        if i < len(params) - 1:
            h = _relu6(h)
    return h


def reference_forward_bf16(x, params):
    h = x
    for i, (w, b) in enumerate(params):
        h = jnp.dot(h.astype(jnp.bfloat16), w.astype(jnp.bfloat16),
                    preferred_element_type=jnp.float32) + b
        if i < len(params) - 1:
            h = _relu6(h)
    return h


if __name__ == "__main__":
    key = jax.random.PRNGKey(0)
    inputs, outputs = 16, 4

    pkey, xk1, xk2, xk3 = jax.random.split(key, 4)
    params = init_params(pkey, inputs, outputs)
    spec, flat = prepare_params(params)          # one-time prep

    def check(x, atol_bf16=2e-2, atol_f32=6e-2):
        out = jax.block_until_ready(qnetwork_forward(x, flat, spec=spec))
        assert out.shape == (x.shape[0], outputs)
        out_f32 = out.astype(jnp.float32)
        ref_b = reference_forward_bf16(x, params)
        ref_f = reference_forward_f32(x, params)
        assert jnp.allclose(out_f32, ref_b, atol=atol_bf16, rtol=atol_bf16), \
            "mismatch vs bf16-matched reference"
        assert jnp.allclose(out_f32, ref_f, atol=atol_f32, rtol=atol_f32), \
            "mismatch vs f32 reference"
        return ref_b

    # Case 1: small tile-aligned batch.
    x1 = jax.random.normal(xk1, (8, inputs), dtype=jnp.float32)
    ref1 = check(x1)

    # Fused-argmax action selection: selected action must achieve (near-)max Q.
    act1 = jax.block_until_ready(qnetwork_select_action(x1, flat, spec=spec))
    assert act1.shape == (8,) and act1.dtype == jnp.int32
    sel_q = jnp.take_along_axis(ref1, act1[:, None], axis=1)[:, 0]
    assert bool(jnp.all(sel_q >= ref1.max(axis=1) - 1e-3)), \
        "fused argmax picked a non-maximal action"

    # Case 2: ragged batch (exercises batch padding).
    x2 = jax.random.normal(xk2, (13, inputs), dtype=jnp.float32)
    check(x2)

    # Case 3: batch > _MIN_SPLIT -> 2 grid steps (both v7x TCs get work).
    x3 = jax.random.normal(xk3, (272, inputs), dtype=jnp.float32)
    check(x3)

    print("KERNEL_OK")
</pallas_src>

<mosaic_0001>
module attributes {stable_mosaic.version = 11 : i64} {
  func.func @kernel(%arg0: i32, %arg1: memref<8x128xf32, #tpu.memory_space<vmem>>, %arg2: memref<128x128xbf16, #tpu.memory_space<vmem>>, %arg3: memref<1x128xf32, #tpu.memory_space<vmem>>, %arg4: memref<128x256xbf16, #tpu.memory_space<vmem>>, %arg5: memref<1x256xf32, #tpu.memory_space<vmem>>, %arg6: memref<256x512xbf16, #tpu.memory_space<vmem>>, %arg7: memref<1x512xf32, #tpu.memory_space<vmem>>, %arg8: memref<512x256xbf16, #tpu.memory_space<vmem>>, %arg9: memref<1x256xf32, #tpu.memory_space<vmem>>, %arg10: memref<256x128xbf16, #tpu.memory_space<vmem>>, %arg11: memref<1x128xf32, #tpu.memory_space<vmem>>, %arg12: memref<128x128xbf16, #tpu.memory_space<vmem>>, %arg13: memref<1x128xf32, #tpu.memory_space<vmem>>, %arg14: memref<8x128xbf16, #tpu.memory_space<vmem>>, %arg15: memref<8x1xi32, #tpu.memory_space<vmem>>) attributes {dimension_semantics = [#tpu.dimension_semantics<parallel>], iteration_bounds = array<i64: 1>, scalar_prefetch = 0 : i64, scratch_operands = 0 : i64, tpu.core_type = #tpu.core_type<tc>, window_params = [{transform_indices = @transform_0, window_bounds = array<i64: 8, 128>}, {pipeline_mode = #tpu.pipeline_mode<synchronous>, transform_indices = @transform_1, window_bounds = array<i64: 128, 128>}, {pipeline_mode = #tpu.pipeline_mode<synchronous>, transform_indices = @transform_2, window_bounds = array<i64: 1, 128>}, {pipeline_mode = #tpu.pipeline_mode<synchronous>, transform_indices = @transform_3, window_bounds = array<i64: 128, 256>}, {pipeline_mode = #tpu.pipeline_mode<synchronous>, transform_indices = @transform_4, window_bounds = array<i64: 1, 256>}, {pipeline_mode = #tpu.pipeline_mode<synchronous>, transform_indices = @transform_5, window_bounds = array<i64: 256, 512>}, {pipeline_mode = #tpu.pipeline_mode<synchronous>, transform_indices = @transform_6, window_bounds = array<i64: 1, 512>}, {pipeline_mode = #tpu.pipeline_mode<synchronous>, transform_indices = @transform_7, window_bounds = array<i64: 512, 256>}, {pipeline_mode = #tpu.pipeline_mode<synchronous>, transform_indices = @transform_8, window_bounds = array<i64: 1, 256>}, {pipeline_mode = #tpu.pipeline_mode<synchronous>, transform_indices = @transform_9, window_bounds = array<i64: 256, 128>}, {pipeline_mode = #tpu.pipeline_mode<synchronous>, transform_indices = @transform_10, window_bounds = array<i64: 1, 128>}, {pipeline_mode = #tpu.pipeline_mode<synchronous>, transform_indices = @transform_11, window_bounds = array<i64: 128, 128>}, {pipeline_mode = #tpu.pipeline_mode<synchronous>, transform_indices = @transform_12, window_bounds = array<i64: 1, 128>}, {transform_indices = @transform_13, window_bounds = array<i64: 8, 128>}, {transform_indices = @transform_14, window_bounds = array<i64: 8, 1>}]} {
    %c0 = arith.constant 0 : index
    %c0_0 = arith.constant 0 : index
    %0 = vector.load %arg1[%c0, %c0_0] : memref<8x128xf32, #tpu.memory_space<vmem>>, vector<8x128xf32>
    %1 = arith.truncf %0 : vector<8x128xf32> to vector<8x128xbf16>
    %c0_1 = arith.constant 0 : index
    %c0_2 = arith.constant 0 : index
    %2 = vector.load %arg2[%c0_1, %c0_2] : memref<128x128xbf16, #tpu.memory_space<vmem>>, vector<128x128xbf16>
    %cst = arith.constant dense<0.000000e+00> : vector<8x128xf32>
    %3 = tpu.matmul %1, %2, %cst {dimension_numbers = #tpu.dot_dimension_numbers<[1], [0], [0], [1], [0, 0, 1, 1], [], []>} : vector<8x128xbf16>, vector<128x128xbf16>, vector<8x128xf32> -> vector<8x128xf32>
    %c0_3 = arith.constant 0 : index
    %c0_4 = arith.constant 0 : index
    %4 = vector.load %arg3[%c0_3, %c0_4] : memref<1x128xf32, #tpu.memory_space<vmem>>, vector<1x128xf32>
    %5 = vector.broadcast %4 : vector<1x128xf32> to vector<8x128xf32>
    %6 = arith.addf %3, %5 : vector<8x128xf32>
    %cst_5 = arith.constant 0.000000e+00 : f32
    %7 = vector.broadcast %cst_5 : f32 to vector<8x128xf32>
    %8 = arith.maximumf %6, %7 : vector<8x128xf32>
    %cst_6 = arith.constant 6.000000e+00 : f32
    %9 = vector.broadcast %cst_6 : f32 to vector<8x128xf32>
    %10 = arith.minimumf %8, %9 : vector<8x128xf32>
    %11 = arith.truncf %10 : vector<8x128xf32> to vector<8x128xbf16>
    %c0_7 = arith.constant 0 : index
    %c0_8 = arith.constant 0 : index
    %12 = vector.load %arg4[%c0_7, %c0_8] : memref<128x256xbf16, #tpu.memory_space<vmem>>, vector<128x256xbf16>
    %cst_9 = arith.constant dense<0.000000e+00> : vector<8x256xf32>
    %13 = tpu.matmul %11, %12, %cst_9 {dimension_numbers = #tpu.dot_dimension_numbers<[1], [0], [0], [1], [0, 0, 1, 1], [], []>} : vector<8x128xbf16>, vector<128x256xbf16>, vector<8x256xf32> -> vector<8x256xf32>
    %c0_10 = arith.constant 0 : index
    %c0_11 = arith.constant 0 : index
    %14 = vector.load %arg5[%c0_10, %c0_11] : memref<1x256xf32, #tpu.memory_space<vmem>>, vector<1x256xf32>
    %15 = vector.broadcast %14 : vector<1x256xf32> to vector<8x256xf32>
    %16 = arith.addf %13, %15 : vector<8x256xf32>
    %cst_12 = arith.constant 0.000000e+00 : f32
    %17 = vector.broadcast %cst_12 : f32 to vector<8x256xf32>
    %18 = arith.maximumf %16, %17 : vector<8x256xf32>
    %cst_13 = arith.constant 6.000000e+00 : f32
    %19 = vector.broadcast %cst_13 : f32 to vector<8x256xf32>
    %20 = arith.minimumf %18, %19 : vector<8x256xf32>
    %21 = arith.truncf %20 : vector<8x256xf32> to vector<8x256xbf16>
    %c0_14 = arith.constant 0 : index
    %c0_15 = arith.constant 0 : index
    %22 = vector.load %arg6[%c0_14, %c0_15] : memref<256x512xbf16, #tpu.memory_space<vmem>>, vector<256x512xbf16>
    %cst_16 = arith.constant dense<0.000000e+00> : vector<8x512xf32>
    %23 = tpu.matmul %21, %22, %cst_16 {dimension_numbers = #tpu.dot_dimension_numbers<[1], [0], [0], [1], [0, 0, 1, 1], [], []>} : vector<8x256xbf16>, vector<256x512xbf16>, vector<8x512xf32> -> vector<8x512xf32>
    %c0_17 = arith.constant 0 : index
    %c0_18 = arith.constant 0 : index
    %24 = vector.load %arg7[%c0_17, %c0_18] : memref<1x512xf32, #tpu.memory_space<vmem>>, vector<1x512xf32>
    %25 = vector.broadcast %24 : vector<1x512xf32> to vector<8x512xf32>
    %26 = arith.addf %23, %25 : vector<8x512xf32>
    %cst_19 = arith.constant 0.000000e+00 : f32
    %27 = vector.broadcast %cst_19 : f32 to vector<8x512xf32>
    %28 = arith.maximumf %26, %27 : vector<8x512xf32>
    %cst_20 = arith.constant 6.000000e+00 : f32
    %29 = vector.broadcast %cst_20 : f32 to vector<8x512xf32>
    %30 = arith.minimumf %28, %29 : vector<8x512xf32>
    %31 = arith.truncf %30 : vector<8x512xf32> to vector<8x512xbf16>
    %c0_21 = arith.constant 0 : index
    %c0_22 = arith.constant 0 : index
    %32 = vector.load %arg8[%c0_21, %c0_22] : memref<512x256xbf16, #tpu.memory_space<vmem>>, vector<512x256xbf16>
    %cst_23 = arith.constant dense<0.000000e+00> : vector<8x256xf32>
    %33 = tpu.matmul %31, %32, %cst_23 {dimension_numbers = #tpu.dot_dimension_numbers<[1], [0], [0], [1], [0, 0, 1, 1], [], []>} : vector<8x512xbf16>, vector<512x256xbf16>, vector<8x256xf32> -> vector<8x256xf32>
    %c0_24 = arith.constant 0 : index
    %c0_25 = arith.constant 0 : index
    %34 = vector.load %arg9[%c0_24, %c0_25] : memref<1x256xf32, #tpu.memory_space<vmem>>, vector<1x256xf32>
    %35 = vector.broadcast %34 : vector<1x256xf32> to vector<8x256xf32>
    %36 = arith.addf %33, %35 : vector<8x256xf32>
    %cst_26 = arith.constant 0.000000e+00 : f32
    %37 = vector.broadcast %cst_26 : f32 to vector<8x256xf32>
    %38 = arith.maximumf %36, %37 : vector<8x256xf32>
    %cst_27 = arith.constant 6.000000e+00 : f32
    %39 = vector.broadcast %cst_27 : f32 to vector<8x256xf32>
    %40 = arith.minimumf %38, %39 : vector<8x256xf32>
    %41 = arith.truncf %40 : vector<8x256xf32> to vector<8x256xbf16>
    %c0_28 = arith.constant 0 : index
    %c0_29 = arith.constant 0 : index
    %42 = vector.load %arg10[%c0_28, %c0_29] : memref<256x128xbf16, #tpu.memory_space<vmem>>, vector<256x128xbf16>
    %cst_30 = arith.constant dense<0.000000e+00> : vector<8x128xf32>
    %43 = tpu.matmul %41, %42, %cst_30 {dimension_numbers = #tpu.dot_dimension_numbers<[1], [0], [0], [1], [0, 0, 1, 1], [], []>} : vector<8x256xbf16>, vector<256x128xbf16>, vector<8x128xf32> -> vector<8x128xf32>
    %c0_31 = arith.constant 0 : index
    %c0_32 = arith.constant 0 : index
    %44 = vector.load %arg11[%c0_31, %c0_32] : memref<1x128xf32, #tpu.memory_space<vmem>>, vector<1x128xf32>
    %45 = vector.broadcast %44 : vector<1x128xf32> to vector<8x128xf32>
    %46 = arith.addf %43, %45 : vector<8x128xf32>
    %cst_33 = arith.constant 0.000000e+00 : f32
    %47 = vector.broadcast %cst_33 : f32 to vector<8x128xf32>
    %48 = arith.maximumf %46, %47 : vector<8x128xf32>
    %cst_34 = arith.constant 6.000000e+00 : f32
    %49 = vector.broadcast %cst_34 : f32 to vector<8x128xf32>
    %50 = arith.minimumf %48, %49 : vector<8x128xf32>
    %51 = arith.truncf %50 : vector<8x128xf32> to vector<8x128xbf16>
    %c0_35 = arith.constant 0 : index
    %c0_36 = arith.constant 0 : index
    %52 = vector.load %arg12[%c0_35, %c0_36] : memref<128x128xbf16, #tpu.memory_space<vmem>>, vector<128x128xbf16>
    %cst_37 = arith.constant dense<0.000000e+00> : vector<8x128xf32>
    %53 = tpu.matmul %51, %52, %cst_37 {dimension_numbers = #tpu.dot_dimension_numbers<[1], [0], [0], [1], [0, 0, 1, 1], [], []>} : vector<8x128xbf16>, vector<128x128xbf16>, vector<8x128xf32> -> vector<8x128xf32>
    %c0_38 = arith.constant 0 : index
    %c0_39 = arith.constant 0 : index
    %54 = vector.load %arg13[%c0_38, %c0_39] : memref<1x128xf32, #tpu.memory_space<vmem>>, vector<1x128xf32>
    %55 = vector.broadcast %54 : vector<1x128xf32> to vector<8x128xf32>
    %56 = arith.addf %53, %55 : vector<8x128xf32>
    %57 = arith.truncf %56 : vector<8x128xf32> to vector<8x128xbf16>
    %c0_40 = arith.constant 0 : index
    %c0_41 = arith.constant 0 : index
    %58 = vector.load %arg14[%c0_40, %c0_41] : memref<8x128xbf16, #tpu.memory_space<vmem>>, vector<8x128xbf16>
    tpu.vector_store %arg14[%c0_40, %c0_41], %57 {strides = array<i32>} : memref<8x128xbf16, #tpu.memory_space<vmem>>, vector<8x128xbf16>,
    %59 = tpu.iota {dimensions = array<i32: 1>} : vector<8x128xi32>
    %c4_i32 = arith.constant 4 : i32
    %60 = vector.broadcast %c4_i32 : i32 to vector<8x128xi32>
    %61 = arith.cmpi slt, %59, %60 : vector<8x128xi32>
    %cst_42 = arith.constant -3.000000e+38 : f32
    %62 = vector.broadcast %cst_42 : f32 to vector<8x128xf32>
    %63 = arith.select %61, %56, %62 : vector<8x128xi1>, vector<8x128xf32>
    %cst_43 = arith.constant dense<0xFF800000> : vector<8xf32>
    %64 = vector.multi_reduction <maximumf>, %63, %cst_43 [1] : vector<8x128xf32> to vector<8xf32>
    %65 = vector.shape_cast %64 : vector<8xf32> to vector<8x1xf32>
    %66 = vector.broadcast %65 : vector<8x1xf32> to vector<8x128xf32>
    %67 = arith.cmpf oge, %63, %66 : vector<8x128xf32>
    %c128_i32 = arith.constant 128 : i32
    %68 = vector.broadcast %c128_i32 : i32 to vector<8x128xi32>
    %69 = arith.select %67, %59, %68 : vector<8x128xi1>, vector<8x128xi32>
    %cst_44 = arith.constant dense<2147483647> : vector<8xi32>
    %70 = vector.multi_reduction <minsi>, %69, %cst_44 [1] : vector<8x128xi32> to vector<8xi32>
    %71 = vector.shape_cast %70 : vector<8xi32> to vector<8x1xi32>
    %c0_45 = arith.constant 0 : index
    %c0_46 = arith.constant 0 : index
    %72 = vector.load %arg15[%c0_45, %c0_46] : memref<8x1xi32, #tpu.memory_space<vmem>>, vector<8x1xi32>
    tpu.vector_store %arg15[%c0_45, %c0_46], %71 {strides = array<i32>} : memref<8x1xi32, #tpu.memory_space<vmem>>, vector<8x1xi32>,
    return
  }
  func.func @transform_0(%arg0: i32) -> (i32, i32) {
    %c0_i32 = arith.constant 0 : i32
    %c0_i32_0 = arith.constant 0 : i32
    return %arg0, %c0_i32 : i32, i32
  }
  func.func @transform_1(%arg0: i32) -> (i32, i32) {
    %c0_i32 = arith.constant 0 : i32
    %c0_i32_0 = arith.constant 0 : i32
    %c0_i32_1 = arith.constant 0 : i32
    return %c0_i32, %c0_i32_0 : i32, i32
  }
  func.func @transform_2(%arg0: i32) -> (i32, i32) {
    %c0_i32 = arith.constant 0 : i32
    %c0_i32_0 = arith.constant 0 : i32
    %c0_i32_1 = arith.constant 0 : i32
    return %c0_i32, %c0_i32_0 : i32, i32
  }
  func.func @transform_3(%arg0: i32) -> (i32, i32) {
    %c0_i32 = arith.constant 0 : i32
    %c0_i32_0 = arith.constant 0 : i32
    %c0_i32_1 = arith.constant 0 : i32
    return %c0_i32, %c0_i32_0 : i32, i32
  }
  func.func @transform_4(%arg0: i32) -> (i32, i32) {
    %c0_i32 = arith.constant 0 : i32
    %c0_i32_0 = arith.constant 0 : i32
    %c0_i32_1 = arith.constant 0 : i32
    return %c0_i32, %c0_i32_0 : i32, i32
  }
  func.func @transform_5(%arg0: i32) -> (i32, i32) {
    %c0_i32 = arith.constant 0 : i32
    %c0_i32_0 = arith.constant 0 : i32
    %c0_i32_1 = arith.constant 0 : i32
    return %c0_i32, %c0_i32_0 : i32, i32
  }
  func.func @transform_6(%arg0: i32) -> (i32, i32) {
    %c0_i32 = arith.constant 0 : i32
    %c0_i32_0 = arith.constant 0 : i32
    %c0_i32_1 = arith.constant 0 : i32
    return %c0_i32, %c0_i32_0 : i32, i32
  }
  func.func @transform_7(%arg0: i32) -> (i32, i32) {
    %c0_i32 = arith.constant 0 : i32
    %c0_i32_0 = arith.constant 0 : i32
    %c0_i32_1 = arith.constant 0 : i32
    return %c0_i32, %c0_i32_0 : i32, i32
  }
  func.func @transform_8(%arg0: i32) -> (i32, i32) {
    %c0_i32 = arith.constant 0 : i32
    %c0_i32_0 = arith.constant 0 : i32
    %c0_i32_1 = arith.constant 0 : i32
    return %c0_i32, %c0_i32_0 : i32, i32
  }
  func.func @transform_9(%arg0: i32) -> (i32, i32) {
    %c0_i32 = arith.constant 0 : i32
    %c0_i32_0 = arith.constant 0 : i32
    %c0_i32_1 = arith.constant 0 : i32
    return %c0_i32, %c0_i32_0 : i32, i32
  }
  func.func @transform_10(%arg0: i32) -> (i32, i32) {
    %c0_i32 = arith.constant 0 : i32
    %c0_i32_0 = arith.constant 0 : i32
    %c0_i32_1 = arith.constant 0 : i32
    return %c0_i32, %c0_i32_0 : i32, i32
  }
  func.func @transform_11(%arg0: i32) -> (i32, i32) {
    %c0_i32 = arith.constant 0 : i32
    %c0_i32_0 = arith.constant 0 : i32
    %c0_i32_1 = arith.constant 0 : i32
    return %c0_i32, %c0_i32_0 : i32, i32
  }
  func.func @transform_12(%arg0: i32) -> (i32, i32) {
    %c0_i32 = arith.constant 0 : i32
    %c0_i32_0 = arith.constant 0 : i32
    %c0_i32_1 = arith.constant 0 : i32
    return %c0_i32, %c0_i32_0 : i32, i32
  }
  func.func @transform_13(%arg0: i32) -> (i32, i32) {
    %c0_i32 = arith.constant 0 : i32
    %c0_i32_0 = arith.constant 0 : i32
    return %arg0, %c0_i32 : i32, i32
  }
  func.func @transform_14(%arg0: i32) -> (i32, i32) {
    %c0_i32 = arith.constant 0 : i32
    %c0_i32_0 = arith.constant 0 : i32
    return %arg0, %c0_i32 : i32, i32
  }
}

</mosaic_0001>

<bundles_post_ra>
// kernel: qnetwork_forward.1
= control target key start
LH: loop header
LB: loop body
LE: loop exit
PB: predicated region body
PF: predicated region fallthrough
CT: control target
= control target key end

     0   :  { %20 = vsyncpa [#allocation3], 0  ;;  %s2677_s0 = inlined_call_operand.vmem [shape: f32[8,128], index: 0, kind: input, shape index: {}]   ;;  %s2678_s1 = inlined_call_operand.hbm [shape: bf16[128,128], index: 1, kind: input, shape index: {}]   ;;  %s2679_s2 = inlined_call_operand.vmem [shape: f32[1,128], index: 2, kind: input, shape index: {}]   ;;  %s2680_s3 = inlined_call_operand.hbm [shape: bf16[128,256], index: 3, kind: input, shape index: {}]   ;;  %s2681_s4 = inlined_call_operand.vmem [shape: f32[1,256], index: 4, kind: input, shape index: {}]   ;;  %s2682_s5 = inlined_call_operand.hbm [shape: bf16[256,512], index: 5, kind: input, shape index: {}]   ;;  %s2683_s6 = inlined_call_operand.vmem [shape: f32[1,512], index: 6, kind: input, shape index: {}]   ;;  %s2684_s7 = inlined_call_operand.hbm [shape: bf16[512,256], index: 7, kind: input, shape index: {}]   ;;  %s2685_s8 = inlined_call_operand.vmem [shape: f32[1,256], index: 8, kind: input, shape index: {}]   ;;  %s2686_s9 = inlined_call_operand.hbm [shape: bf16[256,128], index: 9, kind: input, shape index: {}]   ;;  %s2687_s10 = inlined_call_operand.vmem [shape: f32[1,128], index: 10, kind: input, shape index: {}]   ;;  %s2688_s11 = inlined_call_operand.hbm [shape: bf16[128,128], index: 11, kind: input, shape index: {}]   ;;  %s2689_s12 = inlined_call_operand.vmem [shape: f32[1,128], index: 12, kind: input, shape index: {}]   ;;  %s2690_s13 = inlined_call_operand.vmem [shape: bf16[8,128], index: 13, kind: output, shape index: {0}]   ;;  %s2691_s14 = inlined_call_operand.hbm [shape: s32[8,1], index: 14, kind: output, shape index: {1}]  }
   0x1   :  { %21 = vsyncpa [#allocation6], 0 }
   0x2   :  { %22 = vsyncpa [#allocation9], 0 }
   0x3   :  { %23 = vsyncpa [#allocation12], 0 }
   0x4   :  { %24 = vsyncpa [#allocation4], 0  ;;  %s2415_s29 = smov [#allocation5]   ;;  %s2251_s17 = scalar_lea.hbm %s2680_s3, 2048 }
   0x5   :  { %s46_s30 = sshll.u32 %s2415_s29, 4  ;;  %p2252_p0 = scmp.ne.s32.totalorder %s2680_s3, %s2251_s17  ;;  %s47_s30 = int_to_ptr.vmem [resolvable:$true] %s46_s30 }
   0x6   :  { %p2255_p1 = scmp.lt.u32.totalorder %s2251_s17, %s2680_s3 }
   0x8   :  { %p2257_p2 = pnand %p2255_p1, %p2252_p0 }
   0xa   :  { %2260 = shalt.err (!%p2257_p2)
}
   0xb   :  { %s2261_s22 = scalar_lea.vmem %s47_s30, 2048  ;;  %p2266_p4 = scmp.lt.s32.totalorder %s47_s30, %s47_s30 }
   0xc   :  { %p2262_p3 = scmp.ne.s32.totalorder %s47_s30, %s2261_s22  ;;  %p2267_p5 = scmp.lt.s32.totalorder %s2261_s22, %s2261_s22 }
   0xe   :  { %p2268_p6 = por %p2267_p5, %p2266_p4 }
  0x10   :  { %p2269_p7 = pnand %p2268_p6, %p2262_p3 }
  0x12   :  { %2272 = shalt.err (!%p2269_p7)
}
  0x13   :  { %s2416_s23 = smov 128   ;;  %s2417_s24 = smov 8  }
  0x14   :  { %52 = dma.hbm_to_vmem [thread:$0]  %s2680_s3, 2048, %s47_s30, [#allocation6], %s2416_s23, %s2416_s23, %s2417_s24  }
  0x15   :  { %s2418_s27 = smov [#allocation8]   ;;  %s2419_s29 = smov [#allocation2]  }
  0x16   :  { %s74_s28 = sshll.u32 %s2418_s27, 4  ;;  %s32_s15 = sshll.u32 %s2419_s29, 4  ;;  %s75_s28 = int_to_ptr.vmem [resolvable:$true] %s74_s28  ;;  %s33_s15 = int_to_ptr.vmem [resolvable:$true] %s32_s15 }
  0x17   :  { %s2273_s18 = scalar_lea.hbm %s2684_s7, 8192 }
  0x18   :  { %p2274_p8 = scmp.ne.s32.totalorder %s2684_s7, %s2273_s18  ;;  %p2277_p9 = scmp.lt.u32.totalorder %s2273_s18, %s2684_s7 }
  0x1a   :  { %p2279_p10 = pnand %p2277_p9, %p2274_p8 }
  0x1c   :  { %2282 = shalt.err (!%p2279_p10)
}
  0x1d   :  { %s2283_s3 = scalar_lea.vmem %s75_s28, 8192  ;;  %p2288_p12 = scmp.lt.s32.totalorder %s75_s28, %s75_s28 }
  0x1e   :  { %p2284_p11 = scmp.ne.s32.totalorder %s75_s28, %s2283_s3  ;;  %p2289_p13 = scmp.lt.s32.totalorder %s2283_s3, %s2283_s3 }
  0x20   :  { %p2290_p0 = por %p2289_p13, %p2288_p12 }
  0x22   :  { %p2291_p1 = pnand %p2290_p0, %p2284_p11 }
  0x24   :  { %2294 = shalt.err (!%p2291_p1)
}
  0x25   :  { %80 = dma.hbm_to_vmem [thread:$0]  %s2684_s7, 8192, %s75_s28, [#allocation9], %s2416_s23, %s2416_s23, %s2417_s24  }
  0x26   :  { %s2295_s29 = scalar_lea.hbm %s2678_s1, 1024 }
  0x27   :  { %p2296_p2 = scmp.ne.s32.totalorder %s2678_s1, %s2295_s29  ;;  %p2299_p3 = scmp.lt.u32.totalorder %s2295_s29, %s2678_s1 }
  0x29   :  { %p2301_p4 = pnand %p2299_p3, %p2296_p2 }
  0x2b   :  { %2304 = shalt.err (!%p2301_p4)
}
  0x2c   :  { %s2305_s20 = scalar_lea.vmem %s33_s15, 1024  ;;  %p2310_p6 = scmp.lt.s32.totalorder %s33_s15, %s33_s15 }
  0x2d   :  { %p2306_p5 = scmp.ne.s32.totalorder %s33_s15, %s2305_s20  ;;  %p2311_p7 = scmp.lt.s32.totalorder %s2305_s20, %s2305_s20 }
  0x2f   :  { %p2312_p8 = por %p2311_p7, %p2310_p6 }
  0x31   :  { %p2313_p9 = pnand %p2312_p8, %p2306_p5 }
  0x33   :  { %2316 = shalt.err (!%p2313_p9)
}
  0x34   :  { %s2420_s7 = smov 64   ;;  %s2421_s23 = smov 4  }
  0x35   :  { %38 = dma.hbm_to_vmem [thread:$0]  %s2678_s1, 1024, %s33_s15, [#allocation3], %s2420_s7, %s2420_s7, %s2421_s23  }
  0x36   :  { %s2422_s21 = smov [#allocation7]   ;;  %s2317_s25 = scalar_lea.hbm %s2682_s5, 8192 }
  0x37   :  { %s60_s22 = sshll.u32 %s2422_s21, 4  ;;  %p2318_p10 = scmp.ne.s32.totalorder %s2682_s5, %s2317_s25  ;;  %s61_s22 = int_to_ptr.vmem [resolvable:$true] %s60_s22 }
  0x38   :  { %p2321_p11 = scmp.lt.u32.totalorder %s2317_s25, %s2682_s5 }
  0x3a   :  { %p2323_p12 = pnand %p2321_p11, %p2318_p10 }
  0x3c   :  { %2326 = shalt.err (!%p2323_p12)
}
  0x3d   :  { %s2327_s17 = scalar_lea.vmem %s61_s22, 8192  ;;  %p2332_p0 = scmp.lt.s32.totalorder %s61_s22, %s61_s22 }
  0x3e   :  { %p2328_p13 = scmp.ne.s32.totalorder %s61_s22, %s2327_s17  ;;  %p2333_p1 = scmp.lt.s32.totalorder %s2327_s17, %s2327_s17 }
  0x40   :  { %p2334_p2 = por %p2333_p1, %p2332_p0 }
  0x42   :  { %p2335_p3 = pnand %p2334_p2, %p2328_p13 }
  0x44   :  { %2338 = shalt.err (!%p2335_p3)
}
  0x45   :  { %s2423_s1 = smov 256   ;;  %s2424_s15 = smov 16  }
  0x46   :  { %66 = dma.hbm_to_vmem [thread:$0]  %s2682_s5, 8192, %s61_s22, [#allocation6], %s2423_s1, %s2423_s1, %s2424_s15  }
  0x47   :  { %s2425_s20 = smov [#allocation10]   ;;  %s2426_s28 = smov [#allocation11]  }
  0x48   :  { %s88_s24 = sshll.u32 %s2425_s20, 4  ;;  %s102_s21 = sshll.u32 %s2426_s28, 4  ;;  %s89_s24 = int_to_ptr.vmem [resolvable:$true] %s88_s24  ;;  %s2557_s21 = int_to_ptr.vmem [resolvable:$true] %s102_s21 }
  0x49   :  { %s2339_s25 = scalar_lea.hbm %s2686_s9, 2048 }
  0x4a   :  { %p2340_p4 = scmp.ne.s32.totalorder %s2686_s9, %s2339_s25  ;;  %p2343_p5 = scmp.lt.u32.totalorder %s2339_s25, %s2686_s9 }
  0x4c   :  { %p2345_p6 = pnand %p2343_p5, %p2340_p4 }
  0x4e   :  { %2348 = shalt.err (!%p2345_p6)
}
  0x4f   :  { %s2349_s5 = scalar_lea.vmem %s89_s24, 2048  ;;  %p2354_p8 = scmp.lt.s32.totalorder %s89_s24, %s89_s24 }
  0x50   :  { %p2350_p7 = scmp.ne.s32.totalorder %s89_s24, %s2349_s5  ;;  %p2355_p9 = scmp.lt.s32.totalorder %s2349_s5, %s2349_s5 }
  0x52   :  { %p2356_p10 = por %p2355_p9, %p2354_p8 }
  0x54   :  { %p2357_p11 = pnand %p2356_p10, %p2350_p7 }
  0x56   :  { %2360 = shalt.err (!%p2357_p11)
}
  0x57   :  { %94 = dma.hbm_to_vmem [thread:$0]  %s2686_s9, 2048, %s89_s24, [#allocation9], %s2420_s7, %s2420_s7, %s2421_s23  }
  0x58   :  { %s2361_s18 = scalar_lea.hbm %s2688_s11, 1024 }
  0x59   :  { %p2362_p12 = scmp.ne.s32.totalorder %s2688_s11, %s2361_s18  ;;  %p2365_p13 = scmp.lt.u32.totalorder %s2361_s18, %s2688_s11 }
  0x5b   :  { %p2367_p0 = pnand %p2365_p13, %p2362_p12 }
  0x5d   :  { %2370 = shalt.err (!%p2367_p0)
}
  0x5e   :  { %s2371_s30 = scalar_lea.vmem %s2557_s21, 1024  ;;  %p2376_p2 = scmp.lt.s32.totalorder %s2557_s21, %s2557_s21 }
  0x5f   :  { %p2372_p1 = scmp.ne.s32.totalorder %s2557_s21, %s2371_s30  ;;  %p2377_p3 = scmp.lt.s32.totalorder %s2371_s30, %s2371_s30 }
  0x61   :  { %p2378_p4 = por %p2377_p3, %p2376_p2 }
  0x63   :  { %p2379_p5 = pnand %p2378_p4, %p2372_p1 }
  0x65   :  { %2382 = shalt.err (!%p2379_p5)
}
  0x66   :  { %108 = dma.hbm_to_vmem [thread:$0]  %s2688_s11, 1024, %s2557_s21, [#allocation12], %s2420_s7, %s2420_s7, %s2421_s23  }
  0x67   :  { %2405 = dma.done.wait [#allocation3], 1024  }
  0x68   :  { %2406 = vsyncadd [#allocation3], 4294966272 }
  0x69   :  { %2407 = dma.done.wait [#allocation6], 10240  }
  0x6a   :  { %2408 = vsyncadd [#allocation6], 4294957056 }
  0x6b   :  { %2409 = dma.done.wait [#allocation9], 10240  }
  0x6c   :  { %2410 = vsyncadd [#allocation9], 4294957056 }
  0x6d   :  { %2411 = dma.done.wait [#allocation12], 1024  }
  0x6e   :  { %2412 = vsyncadd [#allocation12], 4294966272  ;;  %v2427_v0 = vmov 0.0   ;;  %vm2428_vm0 = vmmov 0   ;;  %v2003_v1 = vld [vmem:[#allocation2] sm:$0xff]   ;;  %v2004_v2 = vld [vmem:[#allocation2 + $0x8] sm:$0xff]  }
  0x6f   :  { %1941 = vmatprep.subr.bf16.mxu1 %v2427_v0  ;;  %1957 = vmatprep.mubr.msk.bf16.mxu1 %vm2428_vm0, %v2427_v0  ;;  %v2005_v3 = vld [vmem:[#allocation2 + $0x10] sm:$0xff]   ;;  %v2006_v4 = vld [vmem:[#allocation2 + $0x18] sm:$0xff]   ;;  %v2007_v5 = vld [vmem:[#allocation2 + $0x20] sm:$0xff]   ;;  %v2429_v27 = vmov 0   ;;  %vm1698_vm4 = vcmask 7168  }
  0x70   :  { %1942 = vmatpush3.bf16.msra.mxu1 %v2003_v1  ;;  %v2008_v6 = vld [vmem:[#allocation2 + $0x28] sm:$0xff]   ;;  %v2009_v7 = vld [vmem:[#allocation2 + $0x30] sm:$0xff]   ;;  %v2010_v8 = vld [vmem:[#allocation2 + $0x38] sm:$0xff]  }
  0x71   :  { %1943 = vmatprep.subr.bf16.mxu1 %v2427_v0  ;;  %v130_v9 = vld [vmem:[%s2677_s0] sm:$0xff]  ;;  %v2016_v13 = vld [vmem:[#allocation5 + $0x14] ss:$8 sps:$4 sm:$0xff]   ;;  %v2014_v14 = vld [vmem:[#allocation5 + $0x10] ss:$8 sps:$4 sm:$0xff]  }
  0x72   :  { %v2013_v10 = vld [vmem:[#allocation5 + $0x4] ss:$8 sps:$4 sm:$0xff]   ;;  %v2011_v11 = vld [vmem:[#allocation5] ss:$8 sps:$4 sm:$0xff]   ;;  %v131_v12 = vpack.c.bf16 %v130_v9, %v130_v9  ;;  %v2022_v17 = vld [vmem:[#allocation5 + $0x34] ss:$8 sps:$4 sm:$0xff]  }
  0x73   :  { %v2019_v15 = vld [vmem:[#allocation5 + $0x24] ss:$8 sps:$4 sm:$0xff]   ;;  %v2017_v16 = vld [vmem:[#allocation5 + $0x20] ss:$8 sps:$4 sm:$0xff]   ;;  %v2020_v18 = vld [vmem:[#allocation5 + $0x30] ss:$8 sps:$4 sm:$0xff]  }
  0x74   :  { %1944 = vmatpush3.bf16.msra.mxu1 %v2004_v2  ;;  %v2025_v19 = vld [vmem:[#allocation5 + $0x44] ss:$8 sps:$4 sm:$0xff]   ;;  %v2023_v20 = vld [vmem:[#allocation5 + $0x40] ss:$8 sps:$4 sm:$0xff]   ;;  %v2028_v21 = vld [vmem:[#allocation5 + $0x54] ss:$8 sps:$4 sm:$0xff]  }
  0x75   :  { %1945 = vmatprep.subr.bf16.mxu1 %v2427_v0  ;;  %v2026_v22 = vld [vmem:[#allocation5 + $0x50] ss:$8 sps:$4 sm:$0xff]   ;;  %v2031_v23 = vld [vmem:[#allocation5 + $0x64] ss:$8 sps:$4 sm:$0xff]   ;;  %v2029_v24 = vld [vmem:[#allocation5 + $0x60] ss:$8 sps:$4 sm:$0xff]  }
  0x76   :  { %v2034_v25 = vld [vmem:[#allocation5 + $0x74] ss:$8 sps:$4 sm:$0xff]   ;;  %v2032_v26 = vld [vmem:[#allocation5 + $0x70] ss:$8 sps:$4 sm:$0xff]   ;;  %v1722_v56 = vld [vmem:[%s2679_s2] ss:$0 sm:$0xff] }
  0x77   :  { %v2035_v28 = vld [vmem:[#allocation7 + $0x4] ss:$16 sps:$4 sm:$0xff]   ;;  %v2039_v29 = vld [vmem:[#allocation7 + $0xc] ss:$16 sps:$4 sm:$0xff]   ;;  %v2040_v30 = vld [vmem:[#allocation7] ss:$16 sps:$4 sm:$0xff]  }
  0x78   :  { %1946 = vmatpush3.bf16.msra.mxu1 %v2005_v3  ;;  %v2041_v31 = vld [vmem:[#allocation7 + $0x24] ss:$16 sps:$4 sm:$0xff]   ;;  %807 = vmatprep.subr.bf16.mxu0 %v2035_v28  ;;  %v2046_v32 = vld [vmem:[#allocation7 + $0x20] ss:$16 sps:$4 sm:$0xff]   ;;  %v2037_v1 = vld [vmem:[#allocation7 + $0x8] ss:$16 sps:$4 sm:$0xff]  }
  0x79   :  { %1947 = vmatprep.subr.bf16.mxu1 %v2427_v0  ;;  %808 = vmatpush1.bf16.msra.mxu0 %v2040_v30  ;;  %v2047_v33 = vld [vmem:[#allocation7 + $0x44] ss:$16 sps:$4 sm:$0xff]   ;;  %v2052_v34 = vld [vmem:[#allocation7 + $0x40] ss:$16 sps:$4 sm:$0xff]   ;;  %v2045_v3 = vld [vmem:[#allocation7 + $0x2c] ss:$16 sps:$4 sm:$0xff]  }
  0x7a   :  { %809 = vmatprep.subr.bf16.mxu0 %v2041_v31  ;;  %v2053_v35 = vld [vmem:[#allocation7 + $0x64] ss:$16 sps:$4 sm:$0xff]   ;;  %v2058_v36 = vld [vmem:[#allocation7 + $0x60] ss:$16 sps:$4 sm:$0xff]   ;;  %v2063_v9 = vld [vmem:[#allocation7 + $0x8c] ss:$16 sps:$4 sm:$0xff]  }
  0x7b   :  { %v2059_v37 = vld [vmem:[#allocation7 + $0x84] ss:$16 sps:$4 sm:$0xff]   ;;  %v2064_v38 = vld [vmem:[#allocation7 + $0x80] ss:$16 sps:$4 sm:$0xff]   ;;  %v2115_v28 = vld [vmem:[#allocation7 + $0x1a8] ss:$16 sps:$4 sm:$0xff]  }
  0x7c   :  { %1948 = vmatpush3.bf16.msra.mxu1 %v2006_v4  ;;  %v2065_v39 = vld [vmem:[#allocation7 + $0xa4] ss:$16 sps:$4 sm:$0xff]   ;;  %v2070_v40 = vld [vmem:[#allocation7 + $0xa0] ss:$16 sps:$4 sm:$0xff]   ;;  %v2043_v4 = vld [vmem:[#allocation7 + $0x28] ss:$16 sps:$4 sm:$0xff]  }
  0x7d   :  { %1949 = vmatprep.subr.bf16.mxu1 %v2427_v0  ;;  %810 = vmatpush1.bf16.msra.mxu0 %v2046_v32  ;;  %v2071_v41 = vld [vmem:[#allocation7 + $0xc4] ss:$16 sps:$4 sm:$0xff]   ;;  %v2076_v42 = vld [vmem:[#allocation7 + $0xc0] ss:$16 sps:$4 sm:$0xff]   ;;  %v2123_v31 = vld [vmem:[#allocation7 + $0x1cc] ss:$16 sps:$4 sm:$0xff]  }
  0x7e   :  { %811 = vmatprep.subr.bf16.mxu0 %v2047_v33  ;;  %v2077_v43 = vld [vmem:[#allocation7 + $0xe4] ss:$16 sps:$4 sm:$0xff]   ;;  %v2082_v44 = vld [vmem:[#allocation7 + $0xe0] ss:$16 sps:$4 sm:$0xff]   ;;  %v2121_v32 = vld [vmem:[#allocation7 + $0x1c8] ss:$16 sps:$4 sm:$0xff]  }
  0x7f   :  { %v2083_v45 = vld [vmem:[#allocation7 + $0x104] ss:$16 sps:$4 sm:$0xff]   ;;  %v2088_v46 = vld [vmem:[#allocation7 + $0x100] ss:$16 sps:$4 sm:$0xff]  }
  0x80   :  { %1950 = vmatpush3.bf16.msra.mxu1 %v2007_v5  ;;  %v2089_v47 = vld [vmem:[#allocation7 + $0x124] ss:$16 sps:$4 sm:$0xff]   ;;  %v2094_v48 = vld [vmem:[#allocation7 + $0x120] ss:$16 sps:$4 sm:$0xff]   ;;  %v2051_v5 = vld [vmem:[#allocation7 + $0x4c] ss:$16 sps:$4 sm:$0xff]  }
  0x81   :  { %1951 = vmatprep.subr.bf16.mxu1 %v2427_v0  ;;  %812 = vmatpush1.bf16.msra.mxu0 %v2052_v34  ;;  %v2095_v49 = vld [vmem:[#allocation7 + $0x144] ss:$16 sps:$4 sm:$0xff]   ;;  %v2100_v50 = vld [vmem:[#allocation7 + $0x140] ss:$16 sps:$4 sm:$0xff]  }
  0x82   :  { %813 = vmatprep.subr.bf16.mxu0 %v2053_v35  ;;  %v2101_v51 = vld [vmem:[#allocation7 + $0x164] ss:$16 sps:$4 sm:$0xff]   ;;  %v2106_v52 = vld [vmem:[#allocation7 + $0x160] ss:$16 sps:$4 sm:$0xff]   ;;  %v2129_v35 = vld [vmem:[#allocation7 + $0x1ec] ss:$16 sps:$4 sm:$0xff]  }
  0x83   :  { %v2107_v53 = vld [vmem:[#allocation7 + $0x184] ss:$16 sps:$4 sm:$0xff]   ;;  %v2112_v54 = vld [vmem:[#allocation7 + $0x180] ss:$16 sps:$4 sm:$0xff]  }
  0x84   :  { %1952 = vmatpush3.bf16.msra.mxu1 %v2008_v6  ;;  %v2113_v55 = vld [vmem:[#allocation7 + $0x1a4] ss:$16 sps:$4 sm:$0xff]   ;;  %v2049_v6 = vld [vmem:[#allocation7 + $0x48] ss:$16 sps:$4 sm:$0xff]   ;;  %v2124_v33 = vld [vmem:[#allocation7 + $0x1c0] ss:$16 sps:$4 sm:$0xff]  }
  0x85   :  { %1953 = vmatprep.subr.bf16.mxu1 %v2427_v0  ;;  %814 = vmatpush1.bf16.msra.mxu0 %v2058_v36  ;;  %v2119_v30 = vld [vmem:[#allocation7 + $0x1c4] ss:$16 sps:$4 sm:$0xff]   ;;  %v2127_v36 = vld [vmem:[#allocation7 + $0x1e8] ss:$16 sps:$4 sm:$0xff]  }
  0x86   :  { %815 = vmatprep.subr.bf16.mxu0 %v2059_v37  ;;  %v2125_v34 = vld [vmem:[#allocation7 + $0x1e4] ss:$16 sps:$4 sm:$0xff]   ;;  %v2130_v37 = vld [vmem:[#allocation7 + $0x1e0] ss:$16 sps:$4 sm:$0xff]  }
  0x88   :  { %1954 = vmatpush3.bf16.msra.mxu1 %v2009_v7  ;;  %v2057_v7 = vld [vmem:[#allocation7 + $0x6c] ss:$16 sps:$4 sm:$0xff]  }
  0x89   :  { %1955 = vmatprep.subr.bf16.mxu1 %v2427_v0  ;;  %816 = vmatpush1.bf16.msra.mxu0 %v2064_v38  ;;  %v2133_v38 = vld [vmem:[#allocation8 + $0x4] ss:$8 sps:$4 sm:$0xff]  }
  0x8a   :  { %817 = vmatprep.subr.bf16.mxu0 %v2065_v39  ;;  %v264_v39 = vlaneseq }
  0x8c   :  { %1956 = vmatpush3.bf16.msra.mxu1 %v2010_v8  ;;  %v2055_v8 = vld [vmem:[#allocation7 + $0x68] ss:$16 sps:$4 sm:$0xff]  }
  0x8d   :  { %354 = vmatprep.subr.bf16.mxu1 %v2013_v10  ;;  %818 = vmatpush1.bf16.msra.mxu0 %v2070_v40  ;;  %v2061_v10 = vld [vmem:[#allocation7 + $0x88] ss:$16 sps:$4 sm:$0xff]   ;;  %v2611_v40 = vshrl.u32 %v264_v39, 7 }
  0x8e   :  { %819 = vmatprep.subr.bf16.mxu0 %v2071_v41 }
  0x8f   :  { %1958 = vmatmul.mubr.bf16.vlgmr.msra.gmra.mrb[0].mxu1 %v131_v12  ;;  %v2067_v12 = vld [vmem:[#allocation7 + $0xa8] ss:$16 sps:$4 sm:$0xff]   ;;  %v2614_v41 = vsub.s32 0, %v2611_v40 }
  0x90   :  { %355 = vmatpush1.bf16.msra.mxu1 %v2011_v11  ;;  %386 = vmatprep.mubr.bf16.mxu1 %v2429_v27  ;;  %v2069_v11 = vld [vmem:[#allocation7 + $0xac] ss:$16 sps:$4 sm:$0xff]  }
  0x91   :  { %356 = vmatprep.subr.bf16.mxu1 %v2016_v13  ;;  %820 = vmatpush1.bf16.msra.mxu0 %v2076_v42  ;;  %v2075_v13 = vld [vmem:[#allocation7 + $0xcc] ss:$16 sps:$4 sm:$0xff]   ;;  %v262_v42 = vld [vmem:[%s2681_s4] sm:$0x3] }
  0x92   :  { %821 = vmatprep.subr.bf16.mxu0 %v2077_v43  ;;  %v2117_v27 = vld [vmem:[#allocation7 + $0x1ac] ss:$16 sps:$4 sm:$0xff]   ;;  %v2620_v43 = vsub.s32 1, %v2611_v40 }
  0x94   :  { %357 = vmatpush1.bf16.msra.mxu1 %v2014_v14  ;;  %v2073_v14 = vld [vmem:[#allocation7 + $0xc8] ss:$16 sps:$4 sm:$0xff]  }
  0x95   :  { %358 = vmatprep.subr.bf16.mxu1 %v2019_v15  ;;  %822 = vmatpush1.bf16.msra.mxu0 %v2082_v44  ;;  %v2081_v15 = vld [vmem:[#allocation7 + $0xec] ss:$16 sps:$4 sm:$0xff]   ;;  %v267_v44 = vrot.slane %v262_v42, %v2614_v41 }
  0x96   :  { %823 = vmatprep.subr.bf16.mxu0 %v2083_v45  ;;  %v271_v45 = vrot.slane %v262_v42, %v2620_v43  ;;  %v481_v42 = vsub.s32 3, %v2611_v40 }
  0x98   :  { %359 = vmatpush1.bf16.msra.mxu1 %v2017_v16  ;;  %v2079_v16 = vld [vmem:[#allocation7 + $0xe8] ss:$16 sps:$4 sm:$0xff]  }
  0x99   :  { %360 = vmatprep.subr.bf16.mxu1 %v2022_v17  ;;  %824 = vmatpush1.bf16.msra.mxu0 %v2088_v46  ;;  %v2087_v17 = vld [vmem:[#allocation7 + $0x10c] ss:$16 sps:$4 sm:$0xff]  }
  0x9a   :  { %825 = vmatprep.subr.bf16.mxu0 %v2089_v47 }
  0x9c   :  { %361 = vmatpush1.bf16.msra.mxu1 %v2020_v18  ;;  %v2085_v18 = vld [vmem:[#allocation7 + $0x108] ss:$16 sps:$4 sm:$0xff]  }
  0x9d   :  { %362 = vmatprep.subr.bf16.mxu1 %v2025_v19  ;;  %826 = vmatpush1.bf16.msra.mxu0 %v2094_v48  ;;  %v2093_v19 = vld [vmem:[#allocation7 + $0x12c] ss:$16 sps:$4 sm:$0xff]  }
  0x9e   :  { %827 = vmatprep.subr.bf16.mxu0 %v2095_v49 }
  0xa0   :  { %363 = vmatpush1.bf16.msra.mxu1 %v2023_v20  ;;  %v2091_v20 = vld [vmem:[#allocation7 + $0x128] ss:$16 sps:$4 sm:$0xff]  }
  0xa1   :  { %364 = vmatprep.subr.bf16.mxu1 %v2028_v21  ;;  %828 = vmatpush1.bf16.msra.mxu0 %v2100_v50  ;;  %v2099_v21 = vld [vmem:[#allocation7 + $0x14c] ss:$16 sps:$4 sm:$0xff]  }
  0xa2   :  { %829 = vmatprep.subr.bf16.mxu0 %v2101_v51 }
  0xa4   :  { %365 = vmatpush1.bf16.msra.mxu1 %v2026_v22  ;;  %v2097_v22 = vld [vmem:[#allocation7 + $0x148] ss:$16 sps:$4 sm:$0xff]  }
  0xa5   :  { %366 = vmatprep.subr.bf16.mxu1 %v2031_v23  ;;  %830 = vmatpush1.bf16.msra.mxu0 %v2106_v52  ;;  %v2105_v23 = vld [vmem:[#allocation7 + $0x16c] ss:$16 sps:$4 sm:$0xff]  }
  0xa6   :  { %831 = vmatprep.subr.bf16.mxu0 %v2107_v53 }
  0xa8   :  { %367 = vmatpush1.bf16.msra.mxu1 %v2029_v24  ;;  %v2103_v24 = vld [vmem:[#allocation7 + $0x168] ss:$16 sps:$4 sm:$0xff]  }
  0xa9   :  { %368 = vmatprep.subr.bf16.mxu1 %v2034_v25  ;;  %832 = vmatpush1.bf16.msra.mxu0 %v2112_v54  ;;  %v2111_v25 = vld [vmem:[#allocation7 + $0x18c] ss:$16 sps:$4 sm:$0xff]  }
  0xaa   :  { %833 = vmatprep.subr.bf16.mxu0 %v2113_v55 }
  0xac   :  { %369 = vmatpush1.bf16.msra.mxu1 %v2032_v26  ;;  %v2109_v26 = vld [vmem:[#allocation7 + $0x188] ss:$16 sps:$4 sm:$0xff]  }
  0xad   :  { %848 = vmatprep.subr.bf16.mxu1 %v2039_v29  ;;  %v2118_v29 = vld [vmem:[#allocation7 + $0x1a0] ss:$16 sps:$4 sm:$0xff]  }
  0xae   :  { %834 = vmatpush1.bf16.msra.mxu0 %v2118_v29  ;;  %v2229_v29 = vld [vmem:[#allocation10 + $0x48] sm:$0xff]  }
  0xaf   :  { %835 = vmatprep.subr.bf16.mxu0 %v2119_v30  ;;  %v2230_v30 = vld [vmem:[#allocation10 + $0x8] sm:$0xff]  }
  0xb2   :  { %836 = vmatpush1.bf16.msra.mxu0 %v2124_v33  ;;  %v2233_v33 = vld [vmem:[#allocation10 + $0x58] sm:$0xff]  }
  0xb3   :  { %837 = vmatprep.subr.bf16.mxu0 %v2125_v34  ;;  %v2234_v34 = vld [vmem:[#allocation10 + $0x18] sm:$0xff]  }
  0xb6   :  { %838 = vmatpush1.bf16.msra.mxu0 %v2130_v37  ;;  %v2237_v37 = vld [vmem:[#allocation10 + $0x68] sm:$0xff]  }
  0xb7   :  { %1297 = vmatprep.subr.bf16.mxu0 %v2133_v38  ;;  %v2627_v38 = vld [vmem:[%s2683_s6] sm:$0xf] }
 0x162   :  { %v237_v57 = vpop.f32.mrb[0].mxu1 }
 0x163   :  { %v238_v58 = vadd.f32 %v1722_v56, %v237_v57  ;;  %v1959_v59 = vpop.f32.mrb[1].mxu1  ;;  %v2131_v57 = vld [vmem:[#allocation8] ss:$8 sps:$4 sm:$0xff]  }
 0x164   :  { %v240_v60 = vpop.f32.mrb[2].mxu1  ;;  %v2136_v59 = vld [vmem:[#allocation8 + $0x14] ss:$8 sps:$4 sm:$0xff]  }
 0x165   :  { %v243_v61 = vmax.f32 %v238_v58, 0.0  ;;  %v1960_v62 = vpop.f32.mrb[3].mxu1  ;;  %v2134_v60 = vld [vmem:[#allocation8 + $0x10] ss:$8 sps:$4 sm:$0xff]  }
 0x166   :  { %v2137_v62 = vld [vmem:[#allocation8 + $0x20] ss:$8 sps:$4 sm:$0xff]  }
 0x167   :  { %v244_v63 = vmin.f32 %v243_v61, 6.0  ;;  %v2139_v61 = vld [vmem:[#allocation8 + $0x24] ss:$8 sps:$4 sm:$0xff]  }
 0x169   :  { %v245_v2 = vpack.c.bf16 %v244_v63, %v244_v63  ;;  %v2142_v63 = vld [vmem:[#allocation8 + $0x34] ss:$8 sps:$4 sm:$0xff]  }
 0x16b   :  { %387 = vmatmul.mubr.bf16.vlgmr.msra.gmra.mrb[4].mxu1 %v245_v2  ;;  %v2145_v2 = vld [vmem:[#allocation8 + $0x44] ss:$8 sps:$4 sm:$0xff]  }
 0x16c   :  { %849 = vmatpush1.bf16.msra.mxu1 %v2037_v1  ;;  %v2140_v1 = vld [vmem:[#allocation8 + $0x30] ss:$8 sps:$4 sm:$0xff]  }
 0x16d   :  { %850 = vmatprep.subr.bf16.mxu1 %v2045_v3  ;;  %v2143_v3 = vld [vmem:[#allocation8 + $0x40] ss:$8 sps:$4 sm:$0xff]  }
 0x170   :  { %851 = vmatpush1.bf16.msra.mxu1 %v2043_v4  ;;  %v2148_v4 = vld [vmem:[#allocation8 + $0x54] ss:$8 sps:$4 sm:$0xff]  }
 0x171   :  { %852 = vmatprep.subr.bf16.mxu1 %v2051_v5  ;;  %v2146_v5 = vld [vmem:[#allocation8 + $0x50] ss:$8 sps:$4 sm:$0xff]  }
 0x174   :  { %853 = vmatpush1.bf16.msra.mxu1 %v2049_v6  ;;  %v2151_v6 = vld [vmem:[#allocation8 + $0x64] ss:$8 sps:$4 sm:$0xff]  }
 0x175   :  { %854 = vmatprep.subr.bf16.mxu1 %v2057_v7  ;;  %v2149_v7 = vld [vmem:[#allocation8 + $0x60] ss:$8 sps:$4 sm:$0xff]  }
 0x178   :  { %855 = vmatpush1.bf16.msra.mxu1 %v2055_v8  ;;  %v2154_v8 = vld [vmem:[#allocation8 + $0x74] ss:$8 sps:$4 sm:$0xff]  }
 0x179   :  { %856 = vmatprep.subr.bf16.mxu1 %v2063_v9  ;;  %v2152_v9 = vld [vmem:[#allocation8 + $0x70] ss:$8 sps:$4 sm:$0xff]  }
 0x17c   :  { %857 = vmatpush1.bf16.msra.mxu1 %v2061_v10  ;;  %v2157_v10 = vld [vmem:[#allocation8 + $0x84] ss:$8 sps:$4 sm:$0xff]  }
 0x17d   :  { %858 = vmatprep.subr.bf16.mxu1 %v2069_v11  ;;  %v2155_v11 = vld [vmem:[#allocation8 + $0x80] ss:$8 sps:$4 sm:$0xff]  }
 0x180   :  { %859 = vmatpush1.bf16.msra.mxu1 %v2067_v12  ;;  %v2160_v12 = vld [vmem:[#allocation8 + $0x94] ss:$8 sps:$4 sm:$0xff]  }
 0x181   :  { %860 = vmatprep.subr.bf16.mxu1 %v2075_v13  ;;  %v2158_v13 = vld [vmem:[#allocation8 + $0x90] ss:$8 sps:$4 sm:$0xff]  }
 0x184   :  { %861 = vmatpush1.bf16.msra.mxu1 %v2073_v14  ;;  %v2163_v14 = vld [vmem:[#allocation8 + $0xa4] ss:$8 sps:$4 sm:$0xff]  }
 0x185   :  { %862 = vmatprep.subr.bf16.mxu1 %v2081_v15  ;;  %v2161_v15 = vld [vmem:[#allocation8 + $0xa0] ss:$8 sps:$4 sm:$0xff]  }
 0x188   :  { %863 = vmatpush1.bf16.msra.mxu1 %v2079_v16  ;;  %v2166_v16 = vld [vmem:[#allocation8 + $0xb4] ss:$8 sps:$4 sm:$0xff]  }
 0x189   :  { %864 = vmatprep.subr.bf16.mxu1 %v2087_v17  ;;  %v2164_v17 = vld [vmem:[#allocation8 + $0xb0] ss:$8 sps:$4 sm:$0xff]  }
 0x18c   :  { %865 = vmatpush1.bf16.msra.mxu1 %v2085_v18  ;;  %v2169_v18 = vld [vmem:[#allocation8 + $0xc4] ss:$8 sps:$4 sm:$0xff]  }
 0x18d   :  { %866 = vmatprep.subr.bf16.mxu1 %v2093_v19  ;;  %v2167_v19 = vld [vmem:[#allocation8 + $0xc0] ss:$8 sps:$4 sm:$0xff]  }
 0x190   :  { %867 = vmatpush1.bf16.msra.mxu1 %v2091_v20  ;;  %v2172_v20 = vld [vmem:[#allocation8 + $0xd4] ss:$8 sps:$4 sm:$0xff]  }
 0x191   :  { %868 = vmatprep.subr.bf16.mxu1 %v2099_v21  ;;  %v2170_v21 = vld [vmem:[#allocation8 + $0xd0] ss:$8 sps:$4 sm:$0xff]  }
 0x194   :  { %869 = vmatpush1.bf16.msra.mxu1 %v2097_v22  ;;  %v2175_v22 = vld [vmem:[#allocation8 + $0xe4] ss:$8 sps:$4 sm:$0xff]  }
 0x195   :  { %870 = vmatprep.subr.bf16.mxu1 %v2105_v23  ;;  %v2173_v23 = vld [vmem:[#allocation8 + $0xe0] ss:$8 sps:$4 sm:$0xff]  }
 0x198   :  { %871 = vmatpush1.bf16.msra.mxu1 %v2103_v24  ;;  %v2178_v24 = vld [vmem:[#allocation8 + $0xf4] ss:$8 sps:$4 sm:$0xff]  }
 0x199   :  { %872 = vmatprep.subr.bf16.mxu1 %v2111_v25  ;;  %v2176_v25 = vld [vmem:[#allocation8 + $0xf0] ss:$8 sps:$4 sm:$0xff]  }
 0x19c   :  { %873 = vmatpush1.bf16.msra.mxu1 %v2109_v26  ;;  %v2181_v26 = vld [vmem:[#allocation8 + $0x104] ss:$8 sps:$4 sm:$0xff]  }
 0x19d   :  { %874 = vmatprep.subr.bf16.mxu1 %v2117_v27  ;;  %v2227_v27 = vld [vmem:[#allocation10 + $0x40] sm:$0xff]  }
 0x1a0   :  { %875 = vmatpush1.bf16.msra.mxu1 %v2115_v28  ;;  %v2228_v28 = vld [vmem:[#allocation10] sm:$0xff]  }
 0x1a1   :  { %876 = vmatprep.subr.bf16.mxu1 %v2123_v31  ;;  %v2231_v31 = vld [vmem:[#allocation10 + $0x50] sm:$0xff]  }
 0x1a4   :  { %877 = vmatpush1.bf16.msra.mxu1 %v2121_v32  ;;  %v2232_v32 = vld [vmem:[#allocation10 + $0x10] sm:$0xff]  }
 0x1a5   :  { %878 = vmatprep.subr.bf16.mxu1 %v2129_v35  ;;  %v2235_v35 = vld [vmem:[#allocation10 + $0x60] sm:$0xff]  }
 0x1a8   :  { %879 = vmatpush1.bf16.msra.mxu1 %v2127_v36  ;;  %v2236_v36 = vld [vmem:[#allocation10 + $0x20] sm:$0xff]  }
 0x1a9   :  { %1910 = vmatprep.subr.bf16.mxu1 %v2227_v27  ;;  %v477_v27 = vsub.s32 2, %v2611_v40  ;;  %v2224_v40 = vld [vmem:[#allocation8 + $0x1f0] ss:$8 sps:$4 sm:$0xff]  }
 0x23e   :  { %v388_v46 = vpop.f32.mrb[4].mxu1 }
 0x23f   :  { %v389_v47 = vadd.f32 %v388_v46, %v267_v44  ;;  %v390_v48 = vpop.f32.mrb[5].mxu1  ;;  %v470_v44 = vrot.slane %v2627_v38, %v2614_v41  ;;  %v482_v46 = vrot.slane %v2627_v38, %v481_v42 }
 0x240   :  { %v391_v49 = vadd.f32 %v390_v48, %v271_v45  ;;  %v392_v50 = vpop.f32.mrb[6].mxu1  ;;  %v474_v45 = vrot.slane %v2627_v38, %v2620_v43 }
 0x241   :  { %v395_v51 = vmax.f32 %v389_v47, 0.0  ;;  %v393_v52 = vpop.f32.mrb[7].mxu1 }
 0x242   :  { %v396_v53 = vmax.f32 %v391_v49, 0.0 }
 0x243   :  { %v397_v54 = vmin.f32 %v395_v51, 6.0 }
 0x244   :  { %v398_v55 = vmin.f32 %v396_v53, 6.0 }
 0x245   :  { %v399_v58 = vpack.c.bf16 %v397_v54, %v397_v54 }
 0x246   :  { %v400_v56 = vpack.c.bf16 %v398_v55, %v398_v55 }
 0x248   :  { %839 = vmatprep.mubr.bf16.mxu0 %v400_v56  ;;  %880 = vmatprep.mubr.bf16.mxu1 %v400_v56 }
 0x249   :  { %840 = vmatmul.mubr.bf16.vlgmr.msra.gmra.mrb[0].mxu0 %v399_v58  ;;  %881 = vmatmul.mubr.bf16.vlgmr.msra.gmra.mrb[8].mxu1 %v399_v58 }
 0x24a   :  { %1298 = vmatpush1.bf16.msra.mxu0 %v2131_v57  ;;  %1911 = vmatpush3.bf16.msra.mxu1 %v2228_v28  ;;  %v2217_v28 = vld [vmem:[#allocation8 + $0x1c4] ss:$8 sps:$4 sm:$0xff]  }
 0x24b   :  { %1299 = vmatprep.subr.bf16.mxu0 %v2136_v59  ;;  %1912 = vmatprep.subr.bf16.mxu1 %v2229_v29  ;;  %v2215_v29 = vld [vmem:[#allocation8 + $0x1c0] ss:$8 sps:$4 sm:$0xff]  }
 0x24e   :  { %1300 = vmatpush1.bf16.msra.mxu0 %v2134_v60  ;;  %1913 = vmatpush3.bf16.msra.mxu1 %v2230_v30  ;;  %v478_v30 = vrot.slane %v2627_v38, %v477_v27  ;;  %v2238_v38 = vld [vmem:[#allocation10 + $0x28] sm:$0xff]  }
 0x24f   :  { %1301 = vmatprep.subr.bf16.mxu0 %v2139_v61  ;;  %1914 = vmatprep.subr.bf16.mxu1 %v2231_v31  ;;  %v2220_v31 = vld [vmem:[#allocation8 + $0x1d4] ss:$8 sps:$4 sm:$0xff]  }
 0x252   :  { %1302 = vmatpush1.bf16.msra.mxu0 %v2137_v62  ;;  %1915 = vmatpush3.bf16.msra.mxu1 %v2232_v32  ;;  %v2218_v32 = vld [vmem:[#allocation8 + $0x1d0] ss:$8 sps:$4 sm:$0xff]  }
 0x253   :  { %1303 = vmatprep.subr.bf16.mxu0 %v2142_v63  ;;  %1916 = vmatprep.subr.bf16.mxu1 %v2233_v33 }
 0x256   :  { %1304 = vmatpush1.bf16.msra.mxu0 %v2140_v1  ;;  %1917 = vmatpush3.bf16.msra.mxu1 %v2234_v34  ;;  %v2223_v34 = vld [vmem:[#allocation8 + $0x1e4] ss:$8 sps:$4 sm:$0xff]  }
 0x257   :  { %1305 = vmatprep.subr.bf16.mxu0 %v2145_v2  ;;  %1918 = vmatprep.subr.bf16.mxu1 %v2235_v35  ;;  %v2179_v2 = vld [vmem:[#allocation8 + $0x100] ss:$8 sps:$4 sm:$0xff]  }
 0x258   :  { %v2221_v35 = vld [vmem:[#allocation8 + $0x1e0] ss:$8 sps:$4 sm:$0xff]  }
 0x25a   :  { %1306 = vmatpush1.bf16.msra.mxu0 %v2143_v3  ;;  %1919 = vmatpush3.bf16.msra.mxu1 %v2236_v36 }
 0x25b   :  { %1307 = vmatprep.subr.bf16.mxu0 %v2148_v4  ;;  %1920 = vmatprep.subr.bf16.mxu1 %v2237_v37  ;;  %v2184_v4 = vld [vmem:[#allocation8 + $0x114] ss:$8 sps:$4 sm:$0xff]  }
 0x25c   :  { %v2226_v37 = vld [vmem:[#allocation8 + $0x1f4] ss:$8 sps:$4 sm:$0xff]  }
 0x25e   :  { %1308 = vmatpush1.bf16.msra.mxu0 %v2146_v5  ;;  %1921 = vmatpush3.bf16.msra.mxu1 %v2238_v38 }
 0x25f   :  { %1309 = vmatprep.subr.bf16.mxu0 %v2151_v6  ;;  %v2182_v6 = vld [vmem:[#allocation8 + $0x110] ss:$8 sps:$4 sm:$0xff]  }
 0x262   :  { %1310 = vmatpush1.bf16.msra.mxu0 %v2149_v7  ;;  %v2187_v7 = vld [vmem:[#allocation8 + $0x124] ss:$8 sps:$4 sm:$0xff]  }
 0x263   :  { %1311 = vmatprep.subr.bf16.mxu0 %v2154_v8  ;;  %v2185_v8 = vld [vmem:[#allocation8 + $0x120] ss:$8 sps:$4 sm:$0xff]  }
 0x266   :  { %1312 = vmatpush1.bf16.msra.mxu0 %v2152_v9  ;;  %v2190_v9 = vld [vmem:[#allocation8 + $0x134] ss:$8 sps:$4 sm:$0xff]  }
 0x267   :  { %1313 = vmatprep.subr.bf16.mxu0 %v2157_v10  ;;  %v2188_v10 = vld [vmem:[#allocation8 + $0x130] ss:$8 sps:$4 sm:$0xff]  }
 0x26a   :  { %1314 = vmatpush1.bf16.msra.mxu0 %v2155_v11  ;;  %v2193_v11 = vld [vmem:[#allocation8 + $0x144] ss:$8 sps:$4 sm:$0xff]  }
 0x26b   :  { %1315 = vmatprep.subr.bf16.mxu0 %v2160_v12  ;;  %v2191_v12 = vld [vmem:[#allocation8 + $0x140] ss:$8 sps:$4 sm:$0xff]  }
 0x26e   :  { %1316 = vmatpush1.bf16.msra.mxu0 %v2158_v13  ;;  %v2196_v13 = vld [vmem:[#allocation8 + $0x154] ss:$8 sps:$4 sm:$0xff]  }
 0x26f   :  { %1317 = vmatprep.subr.bf16.mxu0 %v2163_v14  ;;  %v2194_v14 = vld [vmem:[#allocation8 + $0x150] ss:$8 sps:$4 sm:$0xff]  }
 0x272   :  { %1318 = vmatpush1.bf16.msra.mxu0 %v2161_v15  ;;  %v2199_v15 = vld [vmem:[#allocation8 + $0x164] ss:$8 sps:$4 sm:$0xff]  }
 0x273   :  { %1319 = vmatprep.subr.bf16.mxu0 %v2166_v16  ;;  %v2197_v16 = vld [vmem:[#allocation8 + $0x160] ss:$8 sps:$4 sm:$0xff]  }
 0x276   :  { %1320 = vmatpush1.bf16.msra.mxu0 %v2164_v17  ;;  %v2202_v17 = vld [vmem:[#allocation8 + $0x174] ss:$8 sps:$4 sm:$0xff]  }
 0x277   :  { %1321 = vmatprep.subr.bf16.mxu0 %v2169_v18  ;;  %v2200_v18 = vld [vmem:[#allocation8 + $0x170] ss:$8 sps:$4 sm:$0xff]  }
 0x27a   :  { %1322 = vmatpush1.bf16.msra.mxu0 %v2167_v19  ;;  %v2205_v19 = vld [vmem:[#allocation8 + $0x184] ss:$8 sps:$4 sm:$0xff]  }
 0x27b   :  { %1323 = vmatprep.subr.bf16.mxu0 %v2172_v20  ;;  %v2203_v20 = vld [vmem:[#allocation8 + $0x180] ss:$8 sps:$4 sm:$0xff]  }
 0x27e   :  { %1324 = vmatpush1.bf16.msra.mxu0 %v2170_v21  ;;  %v2208_v21 = vld [vmem:[#allocation8 + $0x194] ss:$8 sps:$4 sm:$0xff]  }
 0x27f   :  { %1325 = vmatprep.subr.bf16.mxu0 %v2175_v22  ;;  %v2206_v22 = vld [vmem:[#allocation8 + $0x190] ss:$8 sps:$4 sm:$0xff]  }
 0x282   :  { %1326 = vmatpush1.bf16.msra.mxu0 %v2173_v23  ;;  %v2211_v23 = vld [vmem:[#allocation8 + $0x1a4] ss:$8 sps:$4 sm:$0xff]  }
 0x283   :  { %1327 = vmatprep.subr.bf16.mxu0 %v2178_v24  ;;  %v2209_v24 = vld [vmem:[#allocation8 + $0x1a0] ss:$8 sps:$4 sm:$0xff]  }
 0x286   :  { %1328 = vmatpush1.bf16.msra.mxu0 %v2176_v25  ;;  %v2214_v25 = vld [vmem:[#allocation8 + $0x1b4] ss:$8 sps:$4 sm:$0xff]  }
 0x287   :  { %1338 = vmatprep.subr.bf16.mxu0 %v2181_v26  ;;  %v2212_v26 = vld [vmem:[#allocation8 + $0x1b0] ss:$8 sps:$4 sm:$0xff]  }
 0x31c   :  { %v841_v47 = vpop.f32.mrb[0].mxu0  ;;  %v2635_v48 = vpop.f32.mrb[8].mxu1 }
 0x31d   :  { %v842_v49 = vadd.f32 %v841_v47, %v470_v44  ;;  %v843_v50 = vpop.f32.mrb[1].mxu0  ;;  %v884_v51 = vpop.f32.mrb[9].mxu1  ;;  %v883_v33 = vadd.f32 %v2635_v48, %v478_v30  ;;  %v2241_v47 = vld [vmem:[#allocation10 + $0x78] sm:$0xff]  }
 0x31e   :  { %v844_v52 = vadd.f32 %v843_v50, %v474_v45  ;;  %v885_v53 = vadd.f32 %v884_v51, %v482_v46  ;;  %v845_v54 = vpop.f32.mrb[2].mxu0  ;;  %v886_v55 = vpop.f32.mrb[10].mxu1  ;;  %v2239_v45 = vld [vmem:[#allocation10 + $0x70] sm:$0xff]   ;;  %v2242_v48 = vld [vmem:[#allocation10 + $0x38] sm:$0xff]  }
 0x31f   :  { %v889_v56 = vmax.f32 %v842_v49, 0.0  ;;  %v846_v57 = vpop.f32.mrb[3].mxu0  ;;  %v887_v58 = vpop.f32.mrb[11].mxu1  ;;  %v891_v36 = vmax.f32 %v883_v33, 0.0  ;;  %v2240_v46 = vld [vmem:[#allocation10 + $0x30] sm:$0xff]   ;;  %1922 = vmatprep.subr.bf16.mxu1 %v2239_v45 }
 0x320   :  { %v890_v59 = vmax.f32 %v844_v52, 0.0  ;;  %v892_v60 = vmax.f32 %v885_v53, 0.0  ;;  %1923 = vmatpush3.bf16.msra.mxu1 %v2240_v46  ;;  %v965_v49 = vld [vmem:[%s2685_s8] sm:$0x3] }
 0x321   :  { %v893_v61 = vmin.f32 %v889_v56, 6.0  ;;  %v895_v42 = vmin.f32 %v891_v36, 6.0  ;;  %1924 = vmatprep.subr.bf16.mxu1 %v2241_v47  ;;  %v970_v50 = vrot.slane %v965_v49, %v2614_v41  ;;  %v974_v51 = vrot.slane %v965_v49, %v2620_v43  ;;  %v2245_v41 = vld [vmem:[#allocation11 + $0x10] sm:$0xff]   ;;  %v2246_v43 = vld [vmem:[#allocation11 + $0x18] sm:$0xff]  }
 0x322   :  { %v894_v62 = vmin.f32 %v890_v59, 6.0  ;;  %v896_v63 = vmin.f32 %v892_v60, 6.0 }
 0x323   :  { %v897_v3 = vpack.c.bf16 %v893_v61, %v893_v61  ;;  %v899_v44 = vpack.c.bf16 %v895_v42, %v895_v42 }
 0x324   :  { %v898_v1 = vpack.c.bf16 %v894_v62, %v894_v62  ;;  %v900_v5 = vpack.c.bf16 %v896_v63, %v896_v63  ;;  %1925 = vmatpush3.bf16.msra.mxu1 %v2242_v48  ;;  %v2243_v63 = vld [vmem:[#allocation11] sm:$0xff]  }
 0x325   :  { %1961 = vmatprep.subr.bf16.mxu1 %v2427_v0 }
 0x326   :  { %1329 = vmatprep.mubr.bf16.mxu0 %v898_v1 }
 0x327   :  { %1330 = vmatmul.mubr.bf16.vlgmr.msra.gmra.mrb[4].mxu0 %v897_v3  ;;  %v2247_v3 = vld [vmem:[#allocation11 + $0x20] sm:$0xff]  }
 0x328   :  { %1339 = vmatpush1.bf16.msra.mxu0 %v2179_v2  ;;  %1370 = vmatprep.mubr.bf16.mxu0 %v900_v5  ;;  %v2244_v2 = vld [vmem:[#allocation11 + $0x8] sm:$0xff]   ;;  %v2249_v5 = vld [vmem:[#allocation11 + $0x30] sm:$0xff]  }
 0x329   :  { %1340 = vmatprep.subr.bf16.mxu0 %v2184_v4  ;;  %v2248_v4 = vld [vmem:[#allocation11 + $0x28] sm:$0xff]  }
 0x32c   :  { %1341 = vmatpush1.bf16.msra.mxu0 %v2182_v6  ;;  %v2250_v6 = vld [vmem:[#allocation11 + $0x38] sm:$0xff]  }
 0x32d   :  { %1342 = vmatprep.subr.bf16.mxu0 %v2187_v7 }
 0x330   :  { %1343 = vmatpush1.bf16.msra.mxu0 %v2185_v8  ;;  %v1875_v8 = vld [vmem:[%s2687_s10] ss:$0 sm:$0xff] }
 0x331   :  { %1344 = vmatprep.subr.bf16.mxu0 %v2190_v9 }
 0x334   :  { %1345 = vmatpush1.bf16.msra.mxu0 %v2188_v10 }
 0x335   :  { %1346 = vmatprep.subr.bf16.mxu0 %v2193_v11 }
 0x338   :  { %1347 = vmatpush1.bf16.msra.mxu0 %v2191_v12 }
 0x339   :  { %1348 = vmatprep.subr.bf16.mxu0 %v2196_v13 }
 0x33c   :  { %1349 = vmatpush1.bf16.msra.mxu0 %v2194_v14 }
 0x33d   :  { %1350 = vmatprep.subr.bf16.mxu0 %v2199_v15 }
 0x340   :  { %1351 = vmatpush1.bf16.msra.mxu0 %v2197_v16 }
 0x341   :  { %1352 = vmatprep.subr.bf16.mxu0 %v2202_v17  ;;  %v1677_v17 = vand.u32 127, %v264_v39 }
 0x343   :  { %vm1678_vm1 = vcmp.lt.s32.totalorder %v1677_v17, 4 }
 0x344   :  { %1353 = vmatpush1.bf16.msra.mxu0 %v2200_v18 }
 0x345   :  { %1354 = vmatprep.subr.bf16.mxu0 %v2205_v19 }
 0x348   :  { %1355 = vmatpush1.bf16.msra.mxu0 %v2203_v20 }
 0x349   :  { %1356 = vmatprep.subr.bf16.mxu0 %v2208_v21 }
 0x34c   :  { %1357 = vmatpush1.bf16.msra.mxu0 %v2206_v22 }
 0x34d   :  { %1358 = vmatprep.subr.bf16.mxu0 %v2211_v23 }
 0x350   :  { %1359 = vmatpush1.bf16.msra.mxu0 %v2209_v24 }
 0x351   :  { %1360 = vmatprep.subr.bf16.mxu0 %v2214_v25 }
 0x354   :  { %1361 = vmatpush1.bf16.msra.mxu0 %v2212_v26 }
 0x355   :  { %1362 = vmatprep.subr.bf16.mxu0 %v2217_v28 }
 0x358   :  { %1363 = vmatpush1.bf16.msra.mxu0 %v2215_v29 }
 0x359   :  { %1364 = vmatprep.subr.bf16.mxu0 %v2220_v31 }
 0x35c   :  { %1365 = vmatpush1.bf16.msra.mxu0 %v2218_v32 }
 0x35d   :  { %1366 = vmatprep.subr.bf16.mxu0 %v2223_v34 }
 0x360   :  { %1367 = vmatpush1.bf16.msra.mxu0 %v2221_v35 }
 0x361   :  { %1368 = vmatprep.subr.bf16.mxu0 %v2226_v37 }
 0x364   :  { %1369 = vmatpush1.bf16.msra.mxu0 %v2224_v40 }
 0x367   :  { %1371 = vmatmul.mubr.bf16.vlgmr.msra.gmra.mrb[4].mxu0 %v899_v44 }
 0x43a   :  { %v1372_v52 = vpop.f32.mrb[4].mxu0 }
 0x43b   :  { %v1981_v53 = vadd.f32 %v1372_v52, %v970_v50  ;;  %v1374_v54 = vpop.f32.mrb[5].mxu0 }
 0x43c   :  { %v1982_v55 = vadd.f32 %v1374_v54, %v974_v51  ;;  %v1376_v56 = vpop.f32.mrb[6].mxu0 }
 0x43d   :  { %v1379_v57 = vmax.f32 %v1981_v53, 0.0  ;;  %v1377_v58 = vpop.f32.mrb[7].mxu0 }
 0x43e   :  { %v1380_v59 = vmax.f32 %v1982_v55, 0.0 }
 0x43f   :  { %v1381_v60 = vmin.f32 %v1379_v57, 6.0 }
 0x440   :  { %v1382_v61 = vmin.f32 %v1380_v59, 6.0 }
 0x441   :  { %v1383_v1 = vpack.c.bf16 %v1381_v60, %v1381_v60 }
 0x442   :  { %v1384_v62 = vpack.c.bf16 %v1382_v61, %v1382_v61 }
 0x444   :  { %1552 = vmatprep.mubr.bf16.mxu1 %v1384_v62 }
 0x445   :  { %1553 = vmatmul.mubr.bf16.vlgmr.msra.gmra.mrb[12].mxu1 %v1383_v1 }
 0x446   :  { %1962 = vmatpush3.bf16.msra.mxu1 %v2243_v63  ;;  %1977 = vmatprep.mubr.msk.bf16.mxu1 %vm2428_vm0, %v2427_v0 }
 0x447   :  { %1963 = vmatprep.subr.bf16.mxu1 %v2427_v0 }
 0x44a   :  { %1964 = vmatpush3.bf16.msra.mxu1 %v2244_v2 }
 0x44b   :  { %1965 = vmatprep.subr.bf16.mxu1 %v2427_v0 }
 0x44e   :  { %1966 = vmatpush3.bf16.msra.mxu1 %v2245_v41 }
 0x44f   :  { %1967 = vmatprep.subr.bf16.mxu1 %v2427_v0 }
 0x452   :  { %1968 = vmatpush3.bf16.msra.mxu1 %v2246_v43 }
 0x453   :  { %1969 = vmatprep.subr.bf16.mxu1 %v2427_v0 }
 0x456   :  { %1970 = vmatpush3.bf16.msra.mxu1 %v2247_v3 }
 0x457   :  { %1971 = vmatprep.subr.bf16.mxu1 %v2427_v0 }
 0x45a   :  { %1972 = vmatpush3.bf16.msra.mxu1 %v2248_v4 }
 0x45b   :  { %1973 = vmatprep.subr.bf16.mxu1 %v2427_v0 }
 0x45e   :  { %1974 = vmatpush3.bf16.msra.mxu1 %v2249_v5 }
 0x45f   :  { %1975 = vmatprep.subr.bf16.mxu1 %v2427_v0  ;;  %v1892_v0 = vld [vmem:[%s2689_s12] ss:$0 sm:$0xff]  ;;  %s2430_s12 = smov [#allocation13]  }
 0x460   :  { %s1708_s22 = sshll.u32 %s2430_s12, 4  ;;  %s1709_s22 = int_to_ptr.vmem [resolvable:$true] %s1708_s22 }
 0x461   :  { %p2388_p7 = scmp.lt.s32.totalorder %s1709_s22, %s1709_s22 }
 0x462   :  { %1976 = vmatpush3.bf16.msra.mxu1 %v2250_v6 }
 0x518   :  { %v1926_v7 = vpop.f32.mrb[12].mxu1 }
 0x519   :  { %v1927_v9 = vpop.f32.mrb[13].mxu1 }
 0x51a   :  { %v1928_v10 = vadd.f32 %v1927_v9, %v1926_v7  ;;  %v1929_v11 = vpop.f32.mrb[14].mxu1 }
 0x51b   :  { %v1930_v12 = vpop.f32.mrb[15].mxu1 }
 0x51c   :  { %v1555_v13 = vadd.f32 %v1928_v10, %v1875_v8 }
 0x51e   :  { %v1560_v14 = vmax.f32 %v1555_v13, 0.0 }
 0x520   :  { %v1561_v15 = vmin.f32 %v1560_v14, 6.0 }
 0x522   :  { %v1562_v16 = vpack.c.bf16 %v1561_v15, %v1561_v15 }
 0x524   :  { %1978 = vmatmul.mubr.bf16.vlgmr.msra.gmra.mrb[16].mxu1 %v1562_v16 }
 0x5f7   :  { %v1668_v18 = vpop.f32.mrb[16].mxu1 }
 0x5f8   :  { %v1669_v19 = vadd.f32 %v1892_v0, %v1668_v18  ;;  %v1979_v20 = vpop.f32.mrb[17].mxu1 }
 0x5f9   :  { %v1671_v21 = vpop.f32.mrb[18].mxu1 }
 0x5fa   :  { %v1674_v22 = vpack.c.bf16 %v1669_v19, %v1669_v19  ;;  %v1980_v23 = vpop.f32.mrb[19].mxu1  ;;  %v1679_v24 = vsel %vm1678_vm1, %v1669_v19, -3e+38 }
 0x5fb   :  { %1680 = vmax.xlane.f32.xlu0 %v1679_v24 }
 0x5fc   :  { %1675 = vst [vmem:[%s2690_s13] sm:$0xf] %v1674_v22  ;;  %s2383_s13 = scalar_lea.vmem %s1709_s22, 128 }
 0x5fd   :  { %p2384_p6 = scmp.ne.s32.totalorder %s1709_s22, %s2383_s13  ;;  %p2389_p8 = scmp.lt.s32.totalorder %s2383_s13, %s2383_s13 }
 0x5ff   :  { %p2390_p9 = por %p2389_p8, %p2388_p7 }
 0x601   :  { %p2391_p10 = pnand %p2390_p9, %p2384_p6 }
 0x688   :  { %v1681_v25 = vpop.xlane.xlu0 %1680 }
 0x689   :  { %vm1682_vm2 = vcmp.ge.f32.partialorder %v1679_v24, %v1681_v25 }
 0x68a   :  { %v1683_v39 = vsel %vm1682_vm2, %v1677_v17, 128 }
 0x68b   :  { %v1685_v26 = vshra.s32 %v1683_v39, 16  ;;  %v1684_v28 = vand.u32 65535, %v1683_v39 }
 0x68d   :  { %v1687_v27 = vcvt.s32.f32 %v1685_v26  ;;  %v1686_v30 = vcvt.s32.f32 %v1684_v28 }
 0x68f   :  { %1688 = vmin.xlane.f32.xlu0 %v1687_v27 }
 0x71c   :  { %v1689_v29 = vpop.xlane.xlu0 %1688 }
 0x71d   :  { %vm1690_vm3 = vcmp.eq.f32.partialorder %v1687_v27, %v1689_v29  ;;  %v1695_v32 = vcvt.f32.s32 %v1689_v29 }
 0x71e   :  { %v1691_v31 = vsel %vm1690_vm3, %v1686_v30, inf }
 0x71f   :  { %1692 = vmin.xlane.f32.xlu1 %v1691_v31  ;;  %v1696_v34 = vshll.u32 %v1695_v32, 16 }
 0x7ac   :  { %v1693_v33 = vpop.xlane.xlu1 %1692 }
 0x7ad   :  { %v1694_v35 = vcvt.f32.s32 %v1693_v33 }
 0x7af   :  { %v1697_v36 = vadd.s32 %v1696_v34, %v1694_v35 }
 0x7b1   :  { %1699 = vst.msk [vmem:[#allocation13] sm:$0xff] %vm1698_vm4, %v1697_v36 }
 0x7b2   :  { %2394 = shalt.err (!%p2391_p10)
}
 0x7b3   :  { %s2395_s15 = scalar_lea.hbm %s2691_s14, 128 }
 0x7b4   :  { %p2396_p11 = scmp.ne.s32.totalorder %s2691_s14, %s2395_s15  ;;  %p2399_p12 = scmp.lt.u32.totalorder %s2395_s15, %s2691_s14 }
 0x7b6   :  { %p2401_p13 = pnand %p2399_p12, %p2396_p11 }
 0x7b8   :  { %2404 = shalt.err (!%p2401_p13)
}
 0x7b9   :  { %1711 = dma.vmem_to_hbm [thread:$0]  %s1709_s22, 128, %s2691_s14, [#allocation4]  }
 0x7ba   :  { %2413 = dma.done.wait [#allocation4], 128  }
 0x7bb   :  { %2414 = vsyncadd [#allocation4], 4294967168 }
 0x7bc   :  { %1717 = vsyncpa [#allocation3], 1 }
 0x7bd   :  { %1718 = vsyncpa [#allocation6], 1 }
 0x7be   :  { %1719 = vsyncpa [#allocation9], 1 }
 0x7bf   :  { %1720 = vsyncpa [#allocation12], 1 }
 0x7c0   :  { %1721 = vsyncpa [#allocation4], 1 }

</bundles_post_ra>
